<compile_context>
chip_gen: v6e
topology: v6e:2x2x1
jax: 0.10.0
libtpu: 0.0.40
codegen_flags: <defaults>
</compile_context>

<pallas_src>
import jax
import jax.numpy as jnp
from jax.experimental import pallas as pl
from jax.experimental.pallas import tpu as pltpu


def _cdiv(a, b):
    return (a + b - 1) // b


def _round_up(x, m):
    return (x + m - 1) // m * m


def _default_budgets():
    """(target_block_bytes, vmem_limit_bytes), picked per TPU generation."""
    try:
        vmem_cap = pltpu.get_tpu_info().vmem_capacity_bytes
    except Exception:
        vmem_cap = None
    if vmem_cap and vmem_cap <= (80 << 20):
        # v7x-class: 64 MiB VMEM/TC but 3.2 TB/s HBM -> larger steps amortize the
        # ~0.35us/step pipeline overhead (2 x 14 MiB input buffers + output << 48 MiB).
        return 14 << 20, 48 << 20
    # v5e / v6e class (128 MiB physical VMEM): ~8 MiB steps already sit near the HBM
    # roofline; 40 MiB lifts v5e's 16 MiB scoped default with plenty of headroom.
    return 8 << 20, 40 << 20


def _choose_tiles(F, C, P, itemsize, target_block_bytes):
    """Pick (f_tile, p_tile) for the (F, C, P) activation.

    Layout constraints (from the dense 2-D output block (f_tile, p_tile)):
      * f_tile is a multiple of 8 or equals F  (dense sublane stores),
      * p_tile is a multiple of 128 or equals P (dense lane stores),
    while the input block f_tile*C*p_tile*itemsize stays around target_block_bytes.
    Ragged tails are handled by Pallas' masked partial blocks (grid = cdiv), never
    by host-side padding.
    """
    # ---- frame (sublane) tile ----
    if F <= 8:
        f_tile = F
    else:
        by_budget = target_block_bytes // max(1, C * P * itemsize)  # full-P assumption
        by_steps = _cdiv(F, 4)          # keep >= ~4 frame steps for megacore / pipeline
        f_tile = min(by_budget, by_steps)
        f_tile = max(8, (f_tile // 8) * 8)
        f_tile = min(f_tile, _round_up(F, 8))
    # ---- pixel (lane) tile ----
    if P <= 128 or f_tile * C * P * itemsize <= target_block_bytes:
        p_tile = P                      # full extent: no divisibility constraint
    else:
        p_tile = (target_block_bytes // (f_tile * C * itemsize)) // 128 * 128
        p_tile = max(128, min(p_tile, _round_up(P, 128)))
    return f_tile, p_tile


def _conv1x1_sigmoid_kernel(w_ref, x_ref, o_ref):
    # w_ref: (C_in, 1) resident weight column (channels on sublanes)
    # x_ref: (f_tile, C_in, p_tile) activation block
    # o_ref: (f_tile, p_tile)       sublane- AND lane-dense output block
    x = x_ref[...].astype(jnp.float32)
    w = w_ref[...].astype(jnp.float32)                 # (C_in, 1)
    acc = jnp.sum(x * w[None, :, :], axis=1)           # (f_tile, p_tile), f32
    o_ref[...] = jax.nn.sigmoid(acc).astype(o_ref.dtype)


def conv1x1_sigmoid(x3, weight, *, target_block_bytes=None, vmem_limit_bytes=None):
    """x3: (F, C_in, P); weight: (1, C_in).  Returns sigmoid(conv1x1(x3)): (F, P)."""
    F, C, P = x3.shape
    C_out, C_in_w = weight.shape
    assert C_in_w == C, f"weight C_in {C_in_w} != activation C {C}"
    assert C_out == 1, "this Decoder config has a single output channel"

    if target_block_bytes is None or vmem_limit_bytes is None:
        tb, vl = _default_budgets()
        target_block_bytes = tb if target_block_bytes is None else target_block_bytes
        vmem_limit_bytes = vl if vmem_limit_bytes is None else vmem_limit_bytes

    itemsize = jnp.dtype(x3.dtype).itemsize
    f_tile, p_tile = _choose_tiles(F, C, P, itemsize, target_block_bytes)
    grid = (_cdiv(F, f_tile), _cdiv(P, p_tile))

    w_col = weight.T  # (C_in, 1): channels on sublanes for a cheap in-kernel broadcast

    return pl.pallas_call(
        _conv1x1_sigmoid_kernel,
        out_shape=jax.ShapeDtypeStruct((F, P), x3.dtype),
        grid_spec=pltpu.PrefetchScalarGridSpec(
            num_scalar_prefetch=0,
            grid=grid,
            in_specs=[
                pl.BlockSpec((C, 1), lambda i, j: (0, 0)),               # resident weight
                pl.BlockSpec((f_tile, C, p_tile), lambda i, j: (i, 0, j)),
            ],
            out_specs=pl.BlockSpec((f_tile, p_tile), lambda i, j: (i, j)),
        ),
        compiler_params=pltpu.CompilerParams(
            dimension_semantics=("parallel", "parallel"),
            vmem_limit_bytes=vmem_limit_bytes,
        ),
    )(w_col, x3)


def decoder_forward(encoder_outputs, weight, **tile_kwargs):
    """JAX/Pallas equivalent of Decoder.forward for decoder=[('conv','sigmoid',16,1,1,0,1)].

    encoder_outputs: list of arrays; the last one has shape (B, S, C_in, H, W).
    weight: Conv2d weight, (C_out, C_in, 1, 1) or already-squeezed (C_out, C_in).
    Returns (B, S, C_out, H, W).
    """
    x = encoder_outputs[-1]
    B, S, C, H, W = x.shape

    if weight.ndim == 4:
        assert weight.shape[2:] == (1, 1), "Decoder conv must be 1x1"
        weight = weight[:, :, 0, 0]
    C_out = weight.shape[0]

    F, P = B * S, H * W
    x3 = x.reshape(F, C, P)                             # free view of row-major NCHW
    y2 = conv1x1_sigmoid(x3, weight, **tile_kwargs)     # (F, P)
    return y2.reshape(B, S, C_out, H, W)                # free reshape back


if __name__ == "__main__":
    key = jax.random.PRNGKey(0)
    k_x, k_w, k_x2 = jax.random.split(key, 3)

    # Small shapes consistent with the module's forward: (B, S, C=16, H, W), C_out=1.
    B, S, C_in, H, W = 2, 3, 16, 16, 16
    C_out = 1

    x = jax.random.normal(k_x, (B, S, C_in, H, W), dtype=jnp.float32)
    # Deterministic Conv2d(16, 1, 1, bias=False) weight, kaiming-uniform-like bound.
    bound = 1.0 / jnp.sqrt(jnp.float32(C_in))
    weight = jax.random.uniform(
        k_w, (C_out, C_in, 1, 1), dtype=jnp.float32, minval=-bound, maxval=bound
    )

    out = decoder_forward([x], weight)
    out = jax.block_until_ready(out)

    # Reference in plain JAX (same semantics as Conv2d 1x1 (bias=False) + Sigmoid).
    ref = jax.nn.sigmoid(jnp.einsum("bschw,oc->bsohw", x, weight[:, :, 0, 0]))
    assert out.shape == (B, S, C_out, H, W)
    assert jnp.allclose(out, ref, atol=1e-5, rtol=1e-5)

    # Second (still small) shape that forces a multi-step grid with ragged frame and
    # pixel tails, exercising the in-kernel tail masking that replaced jnp.pad.
    B2, S2, H2, W2 = 2, 5, 12, 12
    x2 = jax.random.normal(k_x2, (B2, S2, C_in, H2, W2), dtype=jnp.float32)
    out2 = decoder_forward([x2], weight,
                           target_block_bytes=32 * 1024, vmem_limit_bytes=32 << 20)
    out2 = jax.block_until_ready(out2)
    ref2 = jax.nn.sigmoid(jnp.einsum("bschw,oc->bsohw", x2, weight[:, :, 0, 0]))
    assert out2.shape == (B2, S2, C_out, H2, W2)
    assert jnp.allclose(out2, ref2, atol=1e-5, rtol=1e-5)

    print("KERNEL_OK")
</pallas_src>

<mosaic_0001>
module attributes {stable_mosaic.version = 11 : i64} {
  func.func @_conv1x1_sigmoid_kernel(%arg0: i32, %arg1: i32, %arg2: memref<16x1xf32, #tpu.memory_space<vmem>>, %arg3: memref<6x16x256xf32, #tpu.memory_space<vmem>>, %arg4: memref<6x256xf32, #tpu.memory_space<vmem>>) attributes {dimension_semantics = [#tpu.dimension_semantics<parallel>, #tpu.dimension_semantics<parallel>], iteration_bounds = array<i64: 1, 1>, scalar_prefetch = 0 : i64, scratch_operands = 0 : i64, tpu.core_type = #tpu.core_type<tc>, window_params = [{pipeline_mode = #tpu.pipeline_mode<synchronous>, transform_indices = @transform_0, window_bounds = array<i64: 16, 1>}, {transform_indices = @transform_1, window_bounds = array<i64: 6, 16, 256>}, {transform_indices = @transform_2, window_bounds = array<i64: 6, 256>}]} {
    %c0 = arith.constant 0 : index
    %c0_0 = arith.constant 0 : index
    %c0_1 = arith.constant 0 : index
    %0 = vector.load %arg3[%c0, %c0_0, %c0_1] : memref<6x16x256xf32, #tpu.memory_space<vmem>>, vector<6x16x256xf32>
    %c0_2 = arith.constant 0 : index
    %c0_3 = arith.constant 0 : index
    %1 = vector.load %arg2[%c0_2, %c0_3] : memref<16x1xf32, #tpu.memory_space<vmem>>, vector<16x1xf32>
    %2 = vector.shape_cast %1 : vector<16x1xf32> to vector<1x16x1xf32>
    %3 = vector.broadcast %2 : vector<1x16x1xf32> to vector<6x16x256xf32>
    %4 = arith.mulf %0, %3 : vector<6x16x256xf32>
    %cst = arith.constant dense<0.000000e+00> : vector<6x256xf32>
    %5 = vector.multi_reduction <add>, %4, %cst [1] : vector<6x16x256xf32> to vector<6x256xf32>
    %6 = arith.negf %5 : vector<6x256xf32>
    %7 = math.exp %6 : vector<6x256xf32>
    %cst_4 = arith.constant 1.000000e+00 : f32
    %8 = vector.broadcast %cst_4 : f32 to vector<6x256xf32>
    %9 = arith.addf %8, %7 : vector<6x256xf32>
    %10 = arith.divf %8, %9 : vector<6x256xf32>
    %c0_5 = arith.constant 0 : index
    %c0_6 = arith.constant 0 : index
    %11 = vector.load %arg4[%c0_5, %c0_6] : memref<6x256xf32, #tpu.memory_space<vmem>>, vector<6x256xf32>
    tpu.vector_store %arg4[%c0_5, %c0_6], %10 {strides = array<i32>} : memref<6x256xf32, #tpu.memory_space<vmem>>, vector<6x256xf32>,
    return
  }
  func.func @transform_0(%arg0: i32, %arg1: i32) -> (i32, i32) {
    %c0_i32 = arith.constant 0 : i32
    %c0_i32_0 = arith.constant 0 : i32
    %c0_i32_1 = arith.constant 0 : i32
    return %c0_i32, %c0_i32_0 : i32, i32
  }
  func.func @transform_1(%arg0: i32, %arg1: i32) -> (i32, i32, i32) {
    %c0_i32 = arith.constant 0 : i32
    %c0_i32_0 = arith.constant 0 : i32
    return %arg0, %c0_i32, %arg1 : i32, i32, i32
  }
  func.func @transform_2(%arg0: i32, %arg1: i32) -> (i32, i32) {
    %c0_i32 = arith.constant 0 : i32
    return %arg0, %arg1 : i32, i32
  }
}

</mosaic_0001>

<bundles_post_ra>
// kernel: tpu_custom_call.1
= control target key start
LH: loop header
LB: loop body
LE: loop exit
PB: predicated region body
PF: predicated region fallthrough
CT: control target
= control target key end

     0   :  { %7 = vsyncpa [#allocation3], 0  ;;  %s467_s0 = inlined_call_operand.vmem [shape: f32[16,1], index: 0, kind: input, shape index: {}]   ;;  %s468_s1 = inlined_call_operand.hbm [shape: f32[6,16,256], index: 1, kind: input, shape index: {}]   ;;  %s469_s2 = inlined_call_operand.hbm [shape: f32[6,256], index: 2, kind: output, shape index: {}]  }
   0x1   :  { %8 = vsyncpa [#allocation4], 0  ;;  %s398_s9 = smov [#allocation2]  }
   0x2   :  { %s16_s10 = sshll.u32 %s398_s9, 4  ;;  %s17_s10 = int_to_ptr.vmem [resolvable:$true] %s16_s10 }
   0x3   :  { %s362_s11 = scalar_lea.vmem %s17_s10, 3072  ;;  %p367_p1 = scmp.lt.s32.totalorder %s17_s10, %s17_s10 }
   0x4   :  { %p363_p0 = scmp.ne.s32.totalorder %s17_s10, %s362_s11  ;;  %p368_p2 = scmp.lt.s32.totalorder %s362_s11, %s362_s11 }
   0x6   :  { %p369_p3 = por %p368_p2, %p367_p1 }
   0x8   :  { %p370_p4 = pnand %p369_p3, %p363_p0 }
   0xa   :  { %373 = shalt.err (!%p370_p4)
}
   0xb   :  { %s399_s12 = smov 256   ;;  %s400_s13 = smov 16  }
   0xc   :  { %22 = dma.hbm_to_vmem [thread:$0]  %s468_s1, 3072, %s17_s10, [#allocation3], %s399_s12, %s399_s12, %s400_s13  }
   0xd   :  { %394 = dma.done.wait [#allocation3], 3072  }
   0xe   :  { %395 = vsyncadd [#allocation3], 4294964224  ;;  %v401_v0 = vmov 0   ;;  %v50_v1 = vld [vmem:[%s467_s0] sm:$0xff]  ;;  %v51_v2 = vld [vmem:[%s467_s0 + $0x8] sm:$0xff]  ;;  %vm254_vm0 = vcmask 1041409  }
   0xf   :  { %305 = vset.pattern.permute.xlu0 %v401_v0  ;;  %v26_v3 = vld [vmem:[#allocation2] sm:$0xff]  ;;  %v27_v4 = vld [vmem:[#allocation2 + $0x8] sm:$0xff]  ;;  %v28_v6 = vld [vmem:[#allocation2 + $0x10] sm:$0xff]  ;;  %vm256_vm1 = vcmask 1042434   ;;  %vm258_vm2 = vcmask 1043459   ;;  %vm260_vm3 = vcmask 1044484  }
  0x10   :  { %54 = vperm.xlu0 %305, %v50_v1   ;;  %v29_v7 = vld [vmem:[#allocation2 + $0x18] sm:$0xff]  ;;  %v30_v8 = vld [vmem:[#allocation2 + $0x20] sm:$0xff]  ;;  %v31_v9 = vld [vmem:[#allocation2 + $0x28] sm:$0xff]  ;;  %vm262_vm4 = vcmask 1045509   ;;  %s402_s0 = smov [#allocation5]  }
  0x11   :  { %v32_v10 = vld [vmem:[#allocation2 + $0x30] sm:$0xff]  ;;  %v34_v11 = vld [vmem:[#allocation2 + $0x40] sm:$0xff]  ;;  %v35_v12 = vld [vmem:[#allocation2 + $0x48] sm:$0xff]  ;;  %s279_s1 = sshll.u32 %s402_s0, 4  ;;  %s280_s1 = int_to_ptr.vmem [resolvable:$true] %s279_s1 }
  0x12   :  { %v38_v13 = vld [vmem:[#allocation2 + $0x60] sm:$0xff]  ;;  %v33_v14 = vld [vmem:[#allocation2 + $0x38] sm:$0xff]  ;;  %v36_v15 = vld [vmem:[#allocation2 + $0x50] sm:$0xff]  ;;  %s374_s20 = scalar_lea.vmem %s280_s1, 256  ;;  %p379_p6 = scmp.lt.s32.totalorder %s280_s1, %s280_s1 }
  0x13   :  { %v37_v16 = vld [vmem:[#allocation2 + $0x58] sm:$0xff]  ;;  %v39_v17 = vld [vmem:[#allocation2 + $0x68] sm:$0xff]  ;;  %v40_v18 = vld [vmem:[#allocation2 + $0x70] sm:$0xff]  ;;  %p375_p5 = scmp.ne.s32.totalorder %s280_s1, %s374_s20  ;;  %p380_p7 = scmp.lt.s32.totalorder %s374_s20, %s374_s20 }
  0x14   :  { %59 = vperm.xlu0 %305, %v51_v2   ;;  %v41_v19 = vld [vmem:[#allocation2 + $0x78] sm:$0xff]  ;;  %v44_v24 = vld [vmem:[#allocation2 + $0x90] sm:$0xff] }
  0x15   :  { %v45_v25 = vld [vmem:[#allocation2 + $0x98] sm:$0xff]  ;;  %v48_v26 = vld [vmem:[#allocation2 + $0xb0] sm:$0xff]  ;;  %p381_p8 = por %p380_p7, %p379_p6 }
  0x17   :  { %p382_p9 = pnand %p381_p8, %p375_p5 }
  0x8b   :  { %v427_v5 = vpop.permute.xlu0 %54 }
  0x8c   :  { %v62_v20 = vmul.f32 %v427_v5, %v26_v3  ;;  %v63_v21 = vmul.f32 %v427_v5, %v27_v4  ;;  %v66_v22 = vmul.f32 %v427_v5, %v30_v8  ;;  %v67_v27 = vmul.f32 %v427_v5, %v31_v9  ;;  %v49_v8 = vld [vmem:[#allocation2 + $0xb8] sm:$0xff] }
  0x8d   :  { %v70_v28 = vmul.f32 %v427_v5, %v34_v11  ;;  %v71_v29 = vmul.f32 %v427_v5, %v35_v12  ;;  %v74_v30 = vmul.f32 %v427_v5, %v38_v13  ;;  %v75_v39 = vmul.f32 %v427_v5, %v39_v17  ;;  %v42_v13 = vld [vmem:[#allocation2 + $0x80] sm:$0xff] }
  0x8f   :  { %v432_v23 = vpop.permute.xlu0 %59 }
  0x90   :  { %v64_v31 = vmul.f32 %v432_v23, %v28_v6  ;;  %v65_v32 = vmul.f32 %v432_v23, %v29_v7  ;;  %v68_v33 = vmul.f32 %v432_v23, %v32_v10  ;;  %v69_v34 = vmul.f32 %v432_v23, %v33_v14  ;;  %v43_v14 = vld [vmem:[#allocation2 + $0x88] sm:$0xff] }
  0x91   :  { %v72_v35 = vmul.f32 %v432_v23, %v36_v15  ;;  %v73_v36 = vmul.f32 %v432_v23, %v37_v16  ;;  %v76_v37 = vmul.f32 %v432_v23, %v40_v18  ;;  %v77_v38 = vmul.f32 %v432_v23, %v41_v19  ;;  %v46_v19 = vld [vmem:[#allocation2 + $0xa0] sm:$0xff] }
  0x92   :  { %v448_v40 = vmul.f32 %v432_v23, %v44_v24  ;;  %v451_v41 = vmul.f32 %v432_v23, %v45_v25  ;;  %v454_v42 = vmul.f32 %v432_v23, %v48_v26  ;;  %v86_v43 = vadd.f32 %v64_v31, %v62_v20  ;;  %v47_v20 = vld [vmem:[#allocation2 + $0xa8] sm:$0xff] }
  0x93   :  { %v93_v44 = vadd.f32 %v65_v32, %v63_v21  ;;  %v100_v45 = vadd.f32 %v68_v33, %v66_v22  ;;  %v107_v46 = vadd.f32 %v69_v34, %v67_v27  ;;  %v114_v47 = vadd.f32 %v72_v35, %v70_v28 }
  0x94   :  { %v121_v48 = vadd.f32 %v73_v36, %v71_v29  ;;  %v128_v49 = vadd.f32 %v76_v37, %v74_v30  ;;  %v135_v50 = vadd.f32 %v77_v38, %v75_v39  ;;  %v87_v51 = vrot.slane %v86_v43, 4 }
  0x95   :  { %v94_v52 = vrot.slane %v93_v44, 4  ;;  %v101_v53 = vrot.slane %v100_v45, 4  ;;  %v108_v54 = vrot.slane %v107_v46, 4  ;;  %v115_v55 = vrot.slane %v114_v47, 4 }
  0x96   :  { %v122_v56 = vrot.slane %v121_v48, 4  ;;  %v129_v57 = vrot.slane %v128_v49, 4  ;;  %v136_v58 = vrot.slane %v135_v50, 4  ;;  %v88_v59 = vadd.f32 %v87_v51, %v86_v43 }
  0x97   :  { %v95_v60 = vadd.f32 %v94_v52, %v93_v44  ;;  %v102_v61 = vadd.f32 %v101_v53, %v100_v45  ;;  %v109_v62 = vadd.f32 %v108_v54, %v107_v46  ;;  %v116_v63 = vadd.f32 %v115_v55, %v114_v47 }
  0x98   :  { %v123_v0 = vadd.f32 %v122_v56, %v121_v48  ;;  %v130_v1 = vadd.f32 %v129_v57, %v128_v49  ;;  %v137_v2 = vadd.f32 %v136_v58, %v135_v50  ;;  %v89_v3 = vrot.slane %v88_v59, 2 }
  0x99   :  { %v96_v4 = vrot.slane %v95_v60, 2  ;;  %v103_v6 = vrot.slane %v102_v61, 2  ;;  %v110_v7 = vrot.slane %v109_v62, 2  ;;  %v117_v9 = vrot.slane %v116_v63, 2 }
  0x9a   :  { %v124_v10 = vrot.slane %v123_v0, 2  ;;  %v131_v11 = vrot.slane %v130_v1, 2  ;;  %v138_v12 = vrot.slane %v137_v2, 2  ;;  %v90_v15 = vadd.f32 %v89_v3, %v88_v59 }
  0x9b   :  { %v97_v16 = vadd.f32 %v96_v4, %v95_v60  ;;  %v104_v17 = vadd.f32 %v103_v6, %v102_v61  ;;  %v111_v18 = vadd.f32 %v110_v7, %v109_v62  ;;  %v118_v21 = vadd.f32 %v117_v9, %v116_v63 }
  0x9c   :  { %v125_v22 = vadd.f32 %v124_v10, %v123_v0  ;;  %v132_v24 = vadd.f32 %v131_v11, %v130_v1  ;;  %v139_v25 = vadd.f32 %v138_v12, %v137_v2  ;;  %v85_v26 = vmul.f32 %v432_v23, %v49_v8 }
  0x9d   :  { %v91_v27 = vrot.slane %v90_v15, 1  ;;  %v98_v28 = vrot.slane %v97_v16, 1  ;;  %v105_v29 = vrot.slane %v104_v17, 1  ;;  %v78_v30 = vmul.f32 %v427_v5, %v42_v13 }
  0x9e   :  { %v79_v31 = vmul.f32 %v427_v5, %v43_v14  ;;  %v112_v32 = vrot.slane %v111_v18, 1  ;;  %v119_v33 = vrot.slane %v118_v21, 1  ;;  %v82_v34 = vmul.f32 %v427_v5, %v46_v19 }
  0x9f   :  { %v83_v35 = vmul.f32 %v427_v5, %v47_v20  ;;  %v92_v36 = vadd.f32 %v91_v27, %v90_v15  ;;  %v99_v37 = vadd.f32 %v98_v28, %v97_v16  ;;  %v106_v38 = vadd.f32 %v105_v29, %v104_v17 }
  0xa0   :  { %v126_v39 = vrot.slane %v125_v22, 1  ;;  %v133_v43 = vrot.slane %v132_v24, 1  ;;  %v140_v44 = vrot.slane %v139_v25, 1  ;;  %v142_v23 = vadd.f32 %v448_v40, %v78_v30 }
  0xa1   :  { %v149_v45 = vadd.f32 %v451_v41, %v79_v31  ;;  %v156_v46 = vadd.f32 %v454_v42, %v82_v34  ;;  %v163_v47 = vadd.f32 %v85_v26, %v83_v35  ;;  %v113_v48 = vadd.f32 %v112_v32, %v111_v18 }
  0xa2   :  { %v120_v49 = vadd.f32 %v119_v33, %v118_v21  ;;  %v288_v50 = vmul.f32 -1.442695, %v92_v36  ;;  %v289_v51 = vmul.f32 -1.442695, %v99_v37  ;;  %v143_v52 = vrot.slane %v142_v23, 4 }
  0xa3   :  { %v150_v53 = vrot.slane %v149_v45, 4  ;;  %v157_v5 = vrot.slane %v156_v46, 4  ;;  %v164_v54 = vrot.slane %v163_v47, 4  ;;  %v127_v55 = vadd.f32 %v126_v39, %v125_v22 }
  0xa4   :  { %v134_v56 = vadd.f32 %v133_v43, %v132_v24  ;;  %306 = vpow2.f32 %v288_v50  ;;  %v290_v57 = vmul.f32 -1.442695, %v106_v38  ;;  %v144_v58 = vadd.f32 %v143_v52, %v142_v23 }
  0xa5   :  { %v151_v59 = vadd.f32 %v150_v53, %v149_v45  ;;  %v158_v40 = vadd.f32 %v157_v5, %v156_v46  ;;  %v165_v60 = vadd.f32 %v164_v54, %v163_v47  ;;  %v141_v41 = vadd.f32 %v140_v44, %v139_v25 }
  0xa6   :  { %308 = vpow2.f32 %v289_v51  ;;  %v291_v42 = vmul.f32 -1.442695, %v113_v48  ;;  %v292_v61 = vmul.f32 -1.442695, %v120_v49  ;;  %v145_v62 = vrot.slane %v144_v58, 2 }
  0xa7   :  { %v152_v63 = vrot.slane %v151_v59, 2  ;;  %v159_v0 = vrot.slane %v158_v40, 2  ;;  %v166_v1 = vrot.slane %v165_v60, 2  ;;  %310 = vpow2.f32 %v290_v57 }
  0xa8   :  { %v293_v2 = vmul.f32 -1.442695, %v127_v55  ;;  %v294_v3 = vmul.f32 -1.442695, %v134_v56  ;;  %v146_v4 = vadd.f32 %v145_v62, %v144_v58  ;;  %312 = vpow2.f32 %v291_v42 }
  0xa9   :  { %v153_v6 = vadd.f32 %v152_v63, %v151_v59  ;;  %v160_v7 = vadd.f32 %v159_v0, %v158_v40  ;;  %v167_v8 = vadd.f32 %v166_v1, %v165_v60  ;;  %v295_v9 = vmul.f32 -1.442695, %v141_v41 }
  0xaa   :  { %v147_v10 = vrot.slane %v146_v4, 1  ;;  %314 = vpow2.f32 %v292_v61 }
  0xab   :  { %v154_v11 = vrot.slane %v153_v6, 1  ;;  %v161_v12 = vrot.slane %v160_v7, 1  ;;  %316 = vpow2.f32 %v293_v2  ;;  %v168_v13 = vrot.slane %v167_v8, 1 }
  0xac   :  { %v148_v14 = vadd.f32 %v147_v10, %v146_v4  ;;  %318 = vpow2.f32 %v294_v3 }
  0xad   :  { %v155_v15 = vadd.f32 %v154_v11, %v153_v6  ;;  %v162_v16 = vadd.f32 %v161_v12, %v160_v7  ;;  %v169_v17 = vadd.f32 %v168_v13, %v167_v8  ;;  %320 = vpow2.f32 %v295_v9 }
  0xae   :  { %v296_v18 = vmul.f32 -1.442695, %v148_v14 }
  0xaf   :  { %v297_v19 = vmul.f32 -1.442695, %v155_v15  ;;  %v298_v20 = vmul.f32 -1.442695, %v162_v16  ;;  %v299_v21 = vmul.f32 -1.442695, %v169_v17 }
  0xb0   :  { %322 = vpow2.f32 %v296_v18 }
  0xb1   :  { %v307_v22 = vpop.eup %306  ;;  %324 = vpow2.f32 %v297_v19 }
  0xb2   :  { %v206_v24 = vadd.f32 1.0, %v307_v22  ;;  %326 = vpow2.f32 %v298_v20 }
  0xb3   :  { %v309_v25 = vpop.eup %308  ;;  %328 = vpow2.f32 %v299_v21 }
  0xb4   :  { %v207_v26 = vadd.f32 1.0, %v309_v25  ;;  %v311_v27 = vpop.eup %310  ;;  %330 = vrcp.f32 %v206_v24 }
  0xb5   :  { %v208_v28 = vadd.f32 1.0, %v311_v27  ;;  %v313_v29 = vpop.eup %312 }
  0xb6   :  { %332 = vrcp.f32 %v207_v26  ;;  %v209_v31 = vadd.f32 1.0, %v313_v29 }
  0xb7   :  { %v315_v30 = vpop.eup %314  ;;  %334 = vrcp.f32 %v208_v28 }
  0xb8   :  { %v317_v32 = vpop.eup %316  ;;  %v210_v33 = vadd.f32 1.0, %v315_v30  ;;  %336 = vrcp.f32 %v209_v31 }
  0xb9   :  { %v319_v34 = vpop.eup %318  ;;  %v211_v35 = vadd.f32 1.0, %v317_v32 }
  0xba   :  { %v321_v36 = vpop.eup %320  ;;  %v212_v37 = vadd.f32 1.0, %v319_v34  ;;  %338 = vrcp.f32 %v210_v33 }
  0xbb   :  { %v213_v38 = vadd.f32 1.0, %v321_v36  ;;  %340 = vrcp.f32 %v211_v35 }
  0xbc   :  { %342 = vrcp.f32 %v212_v37 }
  0xbd   :  { %v323_v39 = vpop.eup %322  ;;  %344 = vrcp.f32 %v213_v38 }
  0xbe   :  { %v325_v43 = vpop.eup %324  ;;  %v214_v44 = vadd.f32 1.0, %v323_v39 }
  0xbf   :  { %v327_v23 = vpop.eup %326  ;;  %v215_v45 = vadd.f32 1.0, %v325_v43 }
  0xc0   :  { %v329_v46 = vpop.eup %328  ;;  %v216_v47 = vadd.f32 1.0, %v327_v23  ;;  %346 = vrcp.f32 %v214_v44 }
  0xc1   :  { %v217_v48 = vadd.f32 1.0, %v329_v46  ;;  %348 = vrcp.f32 %v215_v45  ;;  %v331_v49 = vpop.eup %330 }
  0xc2   :  { %350 = vrcp.f32 %v216_v47 }
  0xc3   :  { %v333_v50 = vpop.eup %332  ;;  %352 = vrcp.f32 %v217_v48 }
  0xc4   :  { %v335_v51 = vpop.eup %334 }
  0xc5   :  { %v255_v52 = vsel %vm254_vm0, %v335_v51, %v331_v49  ;;  %v337_v53 = vpop.eup %336 }
  0xc6   :  { %v264_v54 = vsel %vm254_vm0, %v337_v53, %v333_v50 }
  0xc7   :  { %v339_v5 = vpop.eup %338 }
  0xc8   :  { %v341_v55 = vpop.eup %340  ;;  %v257_v56 = vsel %vm256_vm1, %v339_v5, %v255_v52 }
  0xc9   :  { %v265_v57 = vsel %vm256_vm1, %v341_v55, %v264_v54  ;;  %v343_v58 = vpop.eup %342 }
  0xca   :  { %v345_v59 = vpop.eup %344  ;;  %v259_v40 = vsel %vm258_vm2, %v343_v58, %v257_v56 }
  0xcb   :  { %v266_v60 = vsel %vm258_vm2, %v345_v59, %v265_v57 }
  0xcd   :  { %v347_v41 = vpop.eup %346 }
  0xce   :  { %v349_v42 = vpop.eup %348  ;;  %v261_v61 = vsel %vm260_vm3, %v347_v41, %v259_v40 }
  0xcf   :  { %v351_v62 = vpop.eup %350  ;;  %v267_v63 = vsel %vm260_vm3, %v349_v42, %v266_v60 }
  0xd0   :  { %v353_v0 = vpop.eup %352  ;;  %v263_v1 = vsel %vm262_vm4, %v351_v62, %v261_v61 }
  0xd1   :  { %v268_v2 = vsel %vm262_vm4, %v353_v0, %v267_v63  ;;  %271 = vst [vmem:[#allocation5] sm:$0x3f] %v263_v1 }
  0xd2   :  { %272 = vst [vmem:[#allocation5 + $0x8] sm:$0x3f] %v268_v2 }
  0xd3   :  { %385 = shalt.err (!%p382_p9)
}
  0xd4   :  { %282 = dma.vmem_to_hbm [thread:$0]  %s280_s1, 256, %s469_s2, [#allocation4]  }
  0xd5   :  { %396 = dma.done.wait [#allocation4], 256  }
  0xd6   :  { %397 = vsyncadd [#allocation4], 4294967040 }
  0xd7   :  { %286 = vsyncpa [#allocation3], 1 }
  0xd8   :  { %287 = vsyncpa [#allocation4], 1 }

</bundles_post_ra>
